<compile_context>
chip_gen: v7x
topology: tpu7x:2x2x1
jax: 0.10.0
libtpu: 0.0.40
codegen_flags: <defaults>
</compile_context>

<pallas_src>
import jax
import jax.numpy as jnp
from jax.experimental import pallas as pl
from jax.experimental.pallas import tpu as pltpu


def _log_loss_kernel(packed_ref, sum_ref, var_ref):
    # packed_ref: (2, 4) f32 VMEM  -- row 0: [loss1, loss2, loss3, 0]
    #                                 row 1: [lv0,   lv1,   lv2,   0]
    # sum_ref:    (1,)   f32 SMEM  -- scalar weighted loss sum
    # var_ref:    (1, 4) f32 VMEM  -- exp(-log_vars) (padded), reused by VJP
    packed = packed_ref[...]                    # single VMEM load
    losses = packed[0:1, :]                     # (1, 4)
    lv = packed[1:2, :]                         # (1, 4)

    var = jnp.exp(-lv)                          # EUP
    weighted = losses * var + lv                # VPU; pad lane -> 0*1 + 0 = 0

    var_ref[...] = var                          # tiny output, residual for bwd
    sum_ref[0] = jnp.sum(weighted)              # XLU reduce -> scalar via SMEM


def _pack_inputs(loss1, loss2, loss3, log_vars):
    losses = jnp.stack([
        jnp.asarray(loss1, jnp.float32).reshape(()),
        jnp.asarray(loss2, jnp.float32).reshape(()),
        jnp.asarray(loss3, jnp.float32).reshape(()),
        jnp.zeros((), jnp.float32),
    ])                                                       # (4,)
    lv = jnp.concatenate([
        jnp.asarray(log_vars, jnp.float32).reshape(3),
        jnp.zeros((1,), jnp.float32),
    ])                                                       # (4,)
    return jnp.stack([losses, lv])                           # (2, 4)


def _log_loss_pallas(loss1, loss2, loss3, log_vars):
    packed = _pack_inputs(loss1, loss2, loss3, log_vars)

    out_sum, var_row = pl.pallas_call(
        _log_loss_kernel,
        out_shape=(
            jax.ShapeDtypeStruct((1,), jnp.float32),       # weighted loss sum
            jax.ShapeDtypeStruct((1, 4), jnp.float32),     # exp(-log_vars)
        ),
        in_specs=[pl.BlockSpec(memory_space=pltpu.MemorySpace.VMEM)],
        out_specs=(
            pl.BlockSpec(memory_space=pltpu.MemorySpace.SMEM),
            pl.BlockSpec(memory_space=pltpu.MemorySpace.VMEM),
        ),
    )(packed)
    return out_sum[0], var_row[0, :3]


@jax.custom_vjp
def log_loss(loss1, loss2, loss3, log_vars):
    """Forward pass matching log_Loss.forward for scalar losses."""
    out, _ = _log_loss_pallas(loss1, loss2, loss3, log_vars)
    return out


def _log_loss_fwd(loss1, loss2, loss3, log_vars):
    out, var = _log_loss_pallas(loss1, loss2, loss3, log_vars)
    # var = exp(-log_vars) is reused in bwd (no second exp dispatch).
    return out, (loss1, loss2, loss3, log_vars, var)


def _log_loss_bwd(res, g):
    loss1, loss2, loss3, log_vars, var = res       # var: (3,) f32
    g = jnp.asarray(g, jnp.float32)

    d_l1 = jnp.reshape(g * var[0], jnp.shape(loss1))
    d_l2 = jnp.reshape(g * var[1], jnp.shape(loss2))
    d_l3 = jnp.reshape(g * var[2], jnp.shape(loss3))

    # Squeeze residual losses to rank-0 before stacking so d_lv keeps shape (3,).
    losses = jnp.stack([
        jnp.asarray(loss1, jnp.float32).reshape(()),
        jnp.asarray(loss2, jnp.float32).reshape(()),
        jnp.asarray(loss3, jnp.float32).reshape(()),
    ])
    d_lv = jnp.reshape(g * (1.0 - losses * var), jnp.shape(log_vars))
    return d_l1, d_l2, d_l3, d_lv


log_loss.defvjp(_log_loss_fwd, _log_loss_bwd)


def _reference(loss1, loss2, loss3, log_vars):
    var = jnp.exp(-log_vars)
    return (loss1 * var[0] + log_vars[0]
            + loss2 * var[1] + log_vars[1]
            + loss3 * var[2] + log_vars[2])


if __name__ == "__main__":
    # Deterministic parameter init, matching nn.Parameter(torch.zeros(3)).
    log_vars0 = jnp.zeros((3,), dtype=jnp.float32)

    # Deterministic example scalar losses.
    key = jax.random.PRNGKey(0)
    k1, k2, k3 = jax.random.split(key, 3)
    loss1 = jax.random.uniform(k1, (), jnp.float32) * 5.0
    loss2 = jax.random.uniform(k2, (), jnp.float32) * 5.0
    loss3 = jax.random.uniform(k3, (), jnp.float32) * 5.0

    # Forward check at the PyTorch init (log_vars == 0).
    out0 = jax.block_until_ready(log_loss(loss1, loss2, loss3, log_vars0))
    ref0 = _reference(loss1, loss2, loss3, log_vars0)
    assert jnp.allclose(out0, ref0, rtol=1e-5, atol=1e-5), (out0, ref0)

    # Forward check at a non-trivial log_vars value (exercises the exp path).
    log_vars1 = jnp.array([0.1, -0.2, 0.3], dtype=jnp.float32)
    out1 = jax.block_until_ready(log_loss(loss1, loss2, loss3, log_vars1))
    ref1 = _reference(loss1, loss2, loss3, log_vars1)
    assert jnp.allclose(out1, ref1, rtol=1e-5, atol=1e-5), (out1, ref1)

    # Gradient checks (custom_vjp): d loss_sum / d log_vars and d / d loss1.
    g_kernel = jax.grad(log_loss, argnums=3)(loss1, loss2, loss3, log_vars1)
    g_ref = jax.grad(lambda lv: _reference(loss1, loss2, loss3, lv))(log_vars1)
    assert jnp.allclose(g_kernel, g_ref, rtol=1e-5, atol=1e-5), (g_kernel, g_ref)

    gl1_kernel = jax.grad(log_loss, argnums=0)(loss1, loss2, loss3, log_vars1)
    gl1_ref = jax.grad(lambda l: _reference(l, loss2, loss3, log_vars1))(loss1)
    assert jnp.allclose(gl1_kernel, gl1_ref, rtol=1e-5, atol=1e-5), (gl1_kernel, gl1_ref)

    print("KERNEL_OK")
</pallas_src>

<mosaic_0001>
module attributes {stable_mosaic.version = 11 : i64} {
  func.func @_log_loss_kernel(%arg0: memref<2x4xf32, #tpu.memory_space<vmem>>, %arg1: memref<1xf32, #tpu.memory_space<smem>>, %arg2: memref<1x4xf32, #tpu.memory_space<vmem>>) attributes {dimension_semantics = [], scalar_prefetch = 0 : i64, scratch_operands = 0 : i64, tpu.core_type = #tpu.core_type<tc>} {
    %c0 = arith.constant 0 : index
    %c0_0 = arith.constant 0 : index
    %0 = vector.load %arg0[%c0, %c0_0] : memref<2x4xf32, #tpu.memory_space<vmem>>, vector<2x4xf32>
    %1 = vector.extract_strided_slice %0 {offsets = [0, 0], sizes = [1, 4], strides = [1, 1]} : vector<2x4xf32> to vector<1x4xf32>
    %2 = vector.extract_strided_slice %0 {offsets = [1, 0], sizes = [1, 4], strides = [1, 1]} : vector<2x4xf32> to vector<1x4xf32>
    %cst = arith.constant 0.000000e+00 : f32
    %3 = vector.broadcast %cst : f32 to vector<1x4xf32>
    %4 = arith.subf %3, %2 : vector<1x4xf32>
    %5 = math.exp %4 : vector<1x4xf32>
    %6 = arith.mulf %1, %5 : vector<1x4xf32>
    %7 = arith.addf %6, %2 : vector<1x4xf32>
    %c0_1 = arith.constant 0 : index
    %c0_2 = arith.constant 0 : index
    %8 = vector.load %arg2[%c0_1, %c0_2] : memref<1x4xf32, #tpu.memory_space<vmem>>, vector<1x4xf32>
    tpu.vector_store %arg2[%c0_1, %c0_2], %5 {strides = array<i32>} : memref<1x4xf32, #tpu.memory_space<vmem>>, vector<1x4xf32>,
    %9 = vector.shape_cast %7 : vector<1x4xf32> to vector<1x1x4xf32>
    %cst_3 = arith.constant dense<0.000000e+00> : vector<1xf32>
    %10 = vector.multi_reduction <add>, %9, %cst_3 [1, 2] : vector<1x1x4xf32> to vector<1xf32>
    %11 = vector.shape_cast %10 : vector<1xf32> to vector<1x1x1xf32>
    %12 = vector.extract %11[0, 0, 0] : f32 from vector<1x1x1xf32>
    %c0_4 = arith.constant 0 : index
    %13 = memref.load %arg1[%c0_4] : memref<1xf32, #tpu.memory_space<smem>>
    memref.store %12, %arg1[%c0_4] : memref<1xf32, #tpu.memory_space<smem>>
    return
  }
}

</mosaic_0001>

<bundles_post_ra>
// kernel: tpu_custom_call.1
= control target key start
LH: loop header
LB: loop body
LE: loop exit
PB: predicated region body
PF: predicated region fallthrough
CT: control target
= control target key end

     0   :  { %8 = vsyncpa [#allocation3], 0  ;;  %s200_s0 = inlined_call_operand.hbm [shape: f32[2,4], index: 0, kind: input, shape index: {}]   ;;  %s201_s1 = inlined_call_operand.hbm [shape: f32[1], index: 1, kind: output, shape index: {0}]   ;;  %s202_s2 = inlined_call_operand.hbm [shape: f32[1,4], index: 2, kind: output, shape index: {1}]  }
   0x1   :  { %9 = vsyncpa [#allocation5], 0 }
   0x2   :  { %10 = vsyncpa [#allocation4], 0  ;;  %s146_s9 = smov [#allocation2]   ;;  %s86_s13 = scalar_lea.hbm %s200_s0, 32 }
   0x3   :  { %s17_s10 = sshll.u32 %s146_s9, 4  ;;  %p87_p0 = scmp.ne.s32.totalorder %s200_s0, %s86_s13  ;;  %s18_s10 = int_to_ptr.vmem [resolvable:$true] %s17_s10 }
   0x4   :  { %p90_p1 = scmp.lt.u32.totalorder %s86_s13, %s200_s0 }
   0x6   :  { %p92_p2 = pnand %p90_p1, %p87_p0 }
   0x8   :  { %95 = shalt.err (!%p92_p2)
}
   0x9   :  { %s96_s18 = scalar_lea.vmem %s18_s10, 32  ;;  %p101_p4 = scmp.lt.s32.totalorder %s18_s10, %s18_s10 }
   0xa   :  { %p97_p3 = scmp.ne.s32.totalorder %s18_s10, %s96_s18  ;;  %p102_p5 = scmp.lt.s32.totalorder %s96_s18, %s96_s18 }
   0xc   :  { %p103_p6 = por %p102_p5, %p101_p4 }
   0xe   :  { %p104_p7 = pnand %p103_p6, %p97_p3 }
  0x10   :  { %107 = shalt.err (!%p104_p7)
}
  0x11   :  { %20 = dma.hbm_to_vmem [thread:$0]  %s200_s0, 32, %s18_s10, [#allocation3]  }
  0x12   :  { %140 = dma.done.wait [#allocation3], 32  }
  0x13   :  { %141 = vsyncadd [#allocation3], 4294967264  ;;  %v24_v0 = vld [vmem:[#allocation2] sm:$0x3]  ;;  %vm38_vm0 = vcmask 24576   ;;  %vm36_vm1 = vcmask 25601  }
  0x14   :  { %v25_v1 = vsub.f32 0.0, %v24_v0  ;;  %v33_v5 = vrot.slane %v24_v0, 1  ;;  %s147_s21 = smov [#allocation7]  }
  0x15   :  { %s65_s22 = sshll.u32 %s147_s21, 4  ;;  %s66_s22 = int_to_ptr.vmem [resolvable:$true] %s65_s22 }
  0x16   :  { %v26_v2 = vmul.f32 1.442695, %v25_v1  ;;  %s108_s0 = scalar_lea.vmem %s66_s22, 16  ;;  %s112_s23 = scalar_lea.vmem %s66_s22, 32 }
  0x17   :  { %p109_p8 = scmp.ne.s32.totalorder %s66_s22, %s108_s0  ;;  %p113_p9 = scmp.lt.s32.totalorder %s66_s22, %s66_s22 }
  0x18   :  { %84 = vpow2.f32 %v26_v2  ;;  %p114_p10 = scmp.lt.s32.totalorder %s112_s23, %s108_s0 }
  0x1a   :  { %p115_p11 = por %p114_p10, %p113_p9 }
  0x1c   :  { %p116_p12 = pnand %p115_p11, %p109_p8 }
  0x22   :  { %v85_v3 = vpop.eup %84 }
  0x23   :  { %v29_v4 = vrot.slane %v85_v3, 1  ;;  %37 = vst.msk [vmem:[#allocation7 - $0x1] sm:$0x2] %vm36_vm1, %v85_v3 }
  0x25   :  { %v31_v6 = vmul.f32 %v29_v4, %v24_v0 }
  0x27   :  { %v35_v7 = vadd.f32 %v33_v5, %v31_v6 }
  0x29   :  { %v39_v8 = vsel %vm38_vm0, %v35_v7, 0.0 }
  0x2a   :  { %40 = vadd.xlane.f32.xlu0 %v39_v8 }
  0x2b   :  { %119 = shalt.err (!%p116_p12)
}
  0x2c   :  { %s120_s26 = scalar_lea.hbm %s202_s2, 16 }
  0x2d   :  { %p121_p13 = scmp.ne.s32.totalorder %s202_s2, %s120_s26  ;;  %p124_p0 = scmp.lt.u32.totalorder %s120_s26, %s202_s2 }
  0x2f   :  { %p126_p1 = pnand %p124_p0, %p121_p13 }
  0x31   :  { %129 = shalt.err (!%p126_p1)
}
  0x32   :  { %68 = dma.vmem_to_hbm [thread:$0]  %s66_s22, 16, %s202_s2, [#allocation4]  }
  0x33   :  { %s130_s8 = scalar_lea.hbm %s201_s1, 16 }
  0x34   :  { %p131_p2 = scmp.ne.s32.totalorder %s201_s1, %s130_s8  ;;  %p134_p3 = scmp.lt.u32.totalorder %s130_s8, %s201_s1 }
  0x36   :  { %p136_p4 = pnand %p134_p3, %p131_p2 }
  0xb7   :  { %v41_v9 = vpop.xlane.xlu0 %40 }
  0xb8   :  { %v42_v10 = vrot.slane %v41_v9, 4 }
  0xba   :  { %v43_v11 = vadd.f32 %v42_v10, %v41_v9 }
  0xbc   :  { %v44_v12 = vrot.slane %v43_v11, 2 }
  0xbe   :  { %v45_v13 = vadd.f32 %v44_v12, %v43_v11 }
  0xc0   :  { %v46_v14 = vrot.slane %v45_v13, 1 }
  0xc2   :  { %v47_v15 = vadd.f32 %v46_v14, %v45_v13 }
  0xc4   :  { %79 = vpush %v47_v15 }
  0xf5   :  { %s80_s5 = spop %79 }
  0xf6   :  { %50 = sst [smem:[#allocation6]] %s80_s5 }
  0xf7   :  { %139 = shalt.err (!%p136_p4)
}
  0xf8   :  { %s148_s12 = smov [#allocation6]  }
  0xf9   :  { %58 = dma.smem_to_hbm %s148_s12, 16, %s201_s1, [#allocation5]  }
  0xfa   :  { %142 = dma.done.wait [#allocation5], 16  }
  0xfb   :  { %143 = vsyncadd [#allocation5], 4294967280 }
  0xfc   :  { %144 = dma.done.wait [#allocation4], 16  }
  0xfd   :  { %145 = vsyncadd [#allocation4], 4294967280 }
  0xfe   :  { %75 = sfence }
  0xff   :  { %76 = vsyncpa [#allocation3], 1 }
 0x100   :  { %77 = vsyncpa [#allocation4], 1 }
 0x101   :  { %78 = vsyncpa [#allocation5], 1 }

</bundles_post_ra>
